<compile_context>
chip_gen: v6e
topology: v6e:2x2x1
jax: 0.10.0
libtpu: 0.0.40
codegen_flags: <defaults>
</compile_context>

<pallas_src>
import jax
import jax.numpy as jnp
from jax.experimental import pallas as pl
from jax.experimental.pallas import tpu as pltpu


def _round_up(x, m):
    return ((x + m - 1) // m) * m


def _spectral_mix_kernel(x_ref, w_ref, o_ref):
    """Mode-batched channel mix on the MXU (block-complex embedding).

    Per mode m: out[m] = x[m] @ w[m] with x (TB, 2I), w (2I, 2O); the complex
    product is already encoded in w's 2x2 block structure, so this is a single
    real contraction and one lane-dense store.
    """
    o_ref[...] = jnp.einsum(
        'mbi,mio->mbo', x_ref[...], w_ref[...],
        preferred_element_type=jnp.float32,
    )


def _spectral_mix(x_mbi, w_mio, *, tile_modes=64, tile_batch=256):
    """Batched real matmul over modes: (M, B, 2I) @ (M, 2I, 2O) -> (M, B, 2O)."""
    M, B, two_i = x_mbi.shape
    two_o = w_mio.shape[2]

    # Generation-aware VMEM budget: ~75% of this chip's per-core capacity
    # (leaves headroom for compiler scratch / semaphores on v7x's 64 MiB).
    try:
        vmem_cap = pltpu.get_tpu_info().vmem_capacity_bytes
    except Exception:
        vmem_cap = 64 * 1024 * 1024
    budget = int(vmem_cap * 3 // 4)

    # Batch tiling only when B is large; otherwise use a single full-extent
    # batch block and drop the batch grid axis (one long mode loop).
    if B <= tile_batch:
        tb = B
        b_pad = B
    else:
        tb = tile_batch                      # multiple of 8 (sublane rule)
        b_pad = _round_up(B, tb)

    def _step_bytes(t):
        # double-buffered per-step working set: x + w + out blocks, f32.
        return 2 * 4 * t * (tb * two_i + two_i * two_o + tb * two_o)

    tm = max(1, min(tile_modes, M))
    while tm > 1 and _step_bytes(tm) > budget:
        tm = (tm + 1) // 2
    # Keep at least 2 parallel grid steps so v7x megacore has work; the extra
    # step costs ~0.35 us on single-TC chips, which is negligible.
    if b_pad == tb and M > 1 and -(-M // tm) < 2:
        tm = (M + 1) // 2
    m_pad = _round_up(M, tm)

    if m_pad > M or b_pad > B:
        x_mbi = jnp.pad(x_mbi, ((0, m_pad - M), (0, b_pad - B), (0, 0)))
    if m_pad > M:
        w_mio = jnp.pad(w_mio, ((0, m_pad - M), (0, 0), (0, 0)))

    out_shape = jax.ShapeDtypeStruct((m_pad, b_pad, two_o), jnp.float32)

    if b_pad == tb:
        grid = (m_pad // tm,)
        x_spec = pl.BlockSpec((tm, tb, two_i), lambda m: (m, 0, 0))
        w_spec = pl.BlockSpec((tm, two_i, two_o), lambda m: (m, 0, 0))
        o_spec = pl.BlockSpec((tm, tb, two_o), lambda m: (m, 0, 0))
        semantics = ("parallel",)
    else:
        # Batch axis innermost: the weight block index is unchanged between
        # consecutive steps, so Pallas does not re-DMA the weight block.
        grid = (m_pad // tm, b_pad // tb)
        x_spec = pl.BlockSpec((tm, tb, two_i), lambda m, b: (m, b, 0))
        w_spec = pl.BlockSpec((tm, two_i, two_o), lambda m, b: (m, 0, 0))
        o_spec = pl.BlockSpec((tm, tb, two_o), lambda m, b: (m, b, 0))
        semantics = ("parallel", "parallel")

    out = pl.pallas_call(
        _spectral_mix_kernel,
        grid_spec=pltpu.PrefetchScalarGridSpec(
            num_scalar_prefetch=0,
            grid=grid,
            in_specs=[x_spec, w_spec],
            out_specs=o_spec,
        ),
        out_shape=out_shape,
        compiler_params=pltpu.CompilerParams(
            dimension_semantics=semantics,
            vmem_limit_bytes=budget,
        ),
    )(x_mbi, w_mio)

    return out[:M, :B, :]


def fourier_convolution(x, w_real, w_imag, fourier_modes):
    """Forward pass equivalent to the PyTorch FourierConvolution module."""
    B, c_in, N = x.shape
    c_out = w_real.shape[1]
    fourier_channels = N // 2 + 1

    # Truncated spectrum, mode-major layout, real/imag fused on the lane axis.
    x_ft = jnp.fft.rfft(x, axis=-1)[:, :, :fourier_modes]          # (B, I, M) c64
    x_ft_m = jnp.transpose(x_ft, (2, 0, 1))                        # (M, B, I)
    x_mbi = jnp.concatenate(
        [jnp.real(x_ft_m), jnp.imag(x_ft_m)], axis=-1
    ).astype(jnp.float32)                                          # (M, B, 2I)

    # Block-complex weight: [[wr, wi], [-wi, wr]] per mode.
    wr_m = jnp.transpose(w_real.astype(jnp.float32), (2, 0, 1))    # (M, I, O)
    wi_m = jnp.transpose(w_imag.astype(jnp.float32), (2, 0, 1))    # (M, I, O)
    w_top = jnp.concatenate([wr_m, wi_m], axis=-1)                 # (M, I, 2O)
    w_bot = jnp.concatenate([-wi_m, wr_m], axis=-1)                # (M, I, 2O)
    w_mio = jnp.concatenate([w_top, w_bot], axis=1)                # (M, 2I, 2O)

    out = _spectral_mix(x_mbi, w_mio)                              # (M, B, 2O)
    mixed = jnp.transpose(
        jax.lax.complex(out[..., :c_out], out[..., c_out:]), (1, 2, 0)
    )                                                              # (B, O, M) c64

    # Zero-extend the truncated spectrum with lax.pad (no scatter round trip).
    out_ft = jax.lax.pad(
        mixed,
        jnp.array(0, dtype=jnp.complex64),
        ((0, 0, 0), (0, 0, 0), (0, fourier_channels - fourier_modes, 0)),
    )
    return jnp.fft.irfft(out_ft, n=N, axis=-1)                     # (B, O, N) f32


if __name__ == "__main__":
    # Small shapes consistent with the module's forward.
    batch, in_channel, out_channel, N, fourier_modes = 2, 4, 4, 16, 4

    key = jax.random.PRNGKey(0)
    k_x, k_wr, k_wi = jax.random.split(key, 3)

    x = jax.random.normal(k_x, (batch, in_channel, N), dtype=jnp.float32)

    # nn.Parameter(scale * torch.rand(in, out, modes, dtype=cfloat)):
    # real and imag parts each uniform[0,1) scaled by 1/(in+out).
    scale = 1.0 / (in_channel + out_channel)
    w_real = scale * jax.random.uniform(
        k_wr, (in_channel, out_channel, fourier_modes), dtype=jnp.float32)
    w_imag = scale * jax.random.uniform(
        k_wi, (in_channel, out_channel, fourier_modes), dtype=jnp.float32)

    y = fourier_convolution(x, w_real, w_imag, fourier_modes)
    y = jax.block_until_ready(y)

    # Pure-JAX reference for the full forward (einsum done in complex).
    x_ft = jnp.fft.rfft(x, axis=-1)
    weights_c = w_real.astype(jnp.complex64) + 1j * w_imag.astype(jnp.complex64)
    mixed_ref = jnp.einsum("bix,iox->box", x_ft[:, :, :fourier_modes], weights_c)
    out_ft_ref = jnp.zeros((batch, out_channel, N // 2 + 1), dtype=jnp.complex64)
    out_ft_ref = out_ft_ref.at[:, :, :fourier_modes].set(mixed_ref)
    y_ref = jnp.fft.irfft(out_ft_ref, n=N, axis=-1)

    assert y.shape == (batch, out_channel, N)
    assert jnp.allclose(y, y_ref, rtol=1e-5, atol=1e-5)
    print("KERNEL_OK")
</pallas_src>

<mosaic_0001>
module attributes {stable_mosaic.version = 11 : i64} {
  func.func @_spectral_mix_kernel(%arg0: i32, %arg1: memref<2x2x8xf32, #tpu.memory_space<vmem>>, %arg2: memref<2x8x8xf32, #tpu.memory_space<vmem>>, %arg3: memref<2x2x8xf32, #tpu.memory_space<vmem>>) attributes {dimension_semantics = [#tpu.dimension_semantics<parallel>], iteration_bounds = array<i64: 2>, scalar_prefetch = 0 : i64, scratch_operands = 0 : i64, tpu.core_type = #tpu.core_type<tc>, window_params = [{transform_indices = @transform_0, window_bounds = array<i64: 2, 2, 8>}, {transform_indices = @transform_1, window_bounds = array<i64: 2, 8, 8>}, {transform_indices = @transform_2, window_bounds = array<i64: 2, 2, 8>}]} {
    %c0 = arith.constant 0 : index
    %c0_0 = arith.constant 0 : index
    %c0_1 = arith.constant 0 : index
    %0 = vector.load %arg1[%c0, %c0_0, %c0_1] : memref<2x2x8xf32, #tpu.memory_space<vmem>>, vector<2x2x8xf32>
    %c0_2 = arith.constant 0 : index
    %c0_3 = arith.constant 0 : index
    %c0_4 = arith.constant 0 : index
    %1 = vector.load %arg2[%c0_2, %c0_3, %c0_4] : memref<2x8x8xf32, #tpu.memory_space<vmem>>, vector<2x8x8xf32>
    "tpu.trace_start"() <{level = 10 : i32, message = "mbi,mio->mbo"}> : () -> ()
    %cst = arith.constant dense<0.000000e+00> : vector<2x2x8xf32>
    %2 = tpu.matmul %0, %1, %cst {dimension_numbers = #tpu.dot_dimension_numbers<[2], [1], [1], [2], [0, 0, 0, 1, 1, 2], [0], [0]>} : vector<2x2x8xf32>, vector<2x8x8xf32>, vector<2x2x8xf32> -> vector<2x2x8xf32>
    "tpu.trace_stop"() : () -> ()
    %c0_5 = arith.constant 0 : index
    %c0_6 = arith.constant 0 : index
    %c0_7 = arith.constant 0 : index
    %3 = vector.load %arg3[%c0_5, %c0_6, %c0_7] : memref<2x2x8xf32, #tpu.memory_space<vmem>>, vector<2x2x8xf32>
    tpu.vector_store %arg3[%c0_5, %c0_6, %c0_7], %2 {strides = array<i32>} : memref<2x2x8xf32, #tpu.memory_space<vmem>>, vector<2x2x8xf32>,
    return
  }
  func.func @transform_0(%arg0: i32) -> (i32, i32, i32) {
    %c0_i32 = arith.constant 0 : i32
    %c0_i32_0 = arith.constant 0 : i32
    %c0_i32_1 = arith.constant 0 : i32
    return %arg0, %c0_i32, %c0_i32_0 : i32, i32, i32
  }
  func.func @transform_1(%arg0: i32) -> (i32, i32, i32) {
    %c0_i32 = arith.constant 0 : i32
    %c0_i32_0 = arith.constant 0 : i32
    %c0_i32_1 = arith.constant 0 : i32
    return %arg0, %c0_i32, %c0_i32_0 : i32, i32, i32
  }
  func.func @transform_2(%arg0: i32) -> (i32, i32, i32) {
    %c0_i32 = arith.constant 0 : i32
    %c0_i32_0 = arith.constant 0 : i32
    %c0_i32_1 = arith.constant 0 : i32
    return %arg0, %c0_i32, %c0_i32_0 : i32, i32, i32
  }
}

</mosaic_0001>

<bundles_post_ra>
// kernel: tpu_custom_call.1
= control target key start
LH: loop header
LB: loop body
LE: loop exit
PB: predicated region body
PF: predicated region fallthrough
CT: control target
= control target key end

     0   :  { %7 = vsyncpa [#allocation3], 0  ;;  %s926_s0 = inlined_call_operand.hbm [shape: f32[4,2,8], index: 0, kind: input, shape index: {}]   ;;  %s927_s1 = inlined_call_operand.hbm [shape: f32[4,8,8], index: 1, kind: input, shape index: {}]   ;;  %s928_s2 = inlined_call_operand.hbm [shape: f32[4,2,8], index: 2, kind: output, shape index: {}]  }
   0x1   :  { %9 = vsyncpa [#allocation3 + $0x1], 0 }
   0x2   :  { %10 = vsyncpa [#allocation6], 0 }
   0x3   :  { %12 = vsyncpa [#allocation6 + $0x1], 0 }
   0x4   :  { %13 = vsyncpa [#allocation4], 0 }
   0x5   :  { %15 = vsyncpa [#allocation4 + $0x1], 0  ;;  %s717_s9 = smov 0   ;;  %s719_s10 = smov 0  }
   0x6   :  { %s721_s11 = smov 0   ;;  %s723_s12 = smov 0  }
   0x7 LB: > { %s738_s13 = sadd.s32 4294967295, %s689_s12   ;;  %s469_s14 = sadd.s32 4294967294, %s689_s12   ;;  %s689_s12 = sphi %s723_s12, %s944_s12   ;;  %s685_s11 = sphi %s721_s11, %s943_s11   ;;  %s681_s10 = sphi %s719_s10, %s942_s10   ;;  %s677_s9 = sphi %s717_s9, %s941_s9  }
   0x8   : > { %s742_s15 = sadd.s32 1, %s689_s12   ;;  %s28_s16 = sadd.s32 1, %s685_s11 }
   0x9   : > { %s25_s17 = ssub.s32 %s689_s12, %s742_s15  ;;  %p35_p0 = scmp.ne.s32.totalorder %s685_s11, %s681_s10 }
   0xa   : > { %p26_p1 = scmp.eq.s32.totalorder %s25_s17, 0  ;;  %p36_p2 = scmp.eq.s32.totalorder %s689_s12, 0 }
   0xb   : > { %p41_p3 = scmp.ne.s32.totalorder %s681_s10, %s677_s9  ;;  %p42_p4 = scmp.eq.s32.totalorder %s738_s13, 0 }
   0xc   : > { %s754_s18 = scalar_select %p26_p1, %s685_s11, %s28_s16  }
   0xd   : > { %p756_p5 = por %p36_p2, %p35_p0  ;;  %p760_p6 = por %p42_p4, %p41_p3 }
   0xe   : > { %p91_p7 = scmp.eq.s32.totalorder %s738_s13, 1  ;;  %p97_p8 = scmp.eq.s32.totalorder %s469_s14, 1 }
   0xf   : > { %s932_s20 = scalar_select %p760_p6, 1, 0 }
  0x10   : > { %p523_p10 = scmp.lt.s32.totalorder %s689_s12, 2  ;;  %p767_p11 = por %p91_p7, %p35_p0 }
  0x11   : > { %p771_p12 = por %p97_p8, %p41_p3  ;;  %s776_s23 = sand.u32 1, %s685_s11  }
  0x12   : > { %s933_s21 = scalar_select %p767_p11, 1, 0 }
  0x13   : > { %s934_s22 = scalar_select %p771_p12, 1, 0 }
  0x14   : > { %s489_s24 = sshll.u32 %s689_s12, 6  ;;  %s472_s25 = sshll.u32 %s776_s23, 2 }
  0x15   : > { %s783_s28 = scalar_lea.hbm %s926_s0, %s489_s24  ;;  %s121_s29 = scalar_lea.vmem [#allocation2], %s472_s25 }
  0x16   : > { %s128_s30 = sshll.u32 %s121_s29, 4  ;;  %p787_p13 = pnand %p523_p10, %p756_p5  ;;  %s791_s30 = int_to_ptr.vmem [resolvable:$true] %s128_s30 }
  0x17   : > { %s118_s4 = scalar_lea.sflag [#allocation3], %s776_s23  ;;  %s565_s5 = scalar_lea.hbm %s783_s28, 64 }
  0x18   : > { %p566_p0 = scmp.ne.s32.totalorder %s783_s28, %s565_s5  ;;  %p567_p1 = pneg %p787_p13 }
  0x19   : > { %s570_s8 = scalar_lea.hbm %s926_s0, 128  ;;  %p571_p4 = scmp.lt.s32.totalorder %s783_s28, %s926_s0 }
  0x1a   : > { %p568_p2 = pnand %p567_p1, %p566_p0  ;;  %p572_p5 = scmp.lt.s32.totalorder %s570_s8, %s565_s5 }
  0x1c   : > { %p569_p3 = pneg %p568_p2  ;;  %p573_p7 = por %p572_p5, %p571_p4 }
  0x1e   : > { %p574_p8 = pnand %p573_p7, %p569_p3 }
  0x20   : > { %577 = shalt.err (!%p574_p8)
}
  0x21   : > { %s578_s17 = scalar_lea.vmem %s791_s30, 64  ;;  %s691_s19 = smov [#allocation2]  }
  0x22   : > { %p579_p10 = scmp.ne.s32.totalorder %s791_s30, %s578_s17  ;;  %s583_s24 = sshll.u32 %s691_s19, 4  ;;  %s584_s24 = int_to_ptr.vmem [resolvable:$false] %s583_s24 }
  0x23   : > { %s585_s25 = scalar_lea.vmem %s584_s24, 128  ;;  %p586_p9 = scmp.lt.s32.totalorder %s791_s30, %s584_s24 }
  0x24   : > { %p581_p0 = pnand %p579_p10, %p567_p1  ;;  %p587_p12 = scmp.lt.s32.totalorder %s585_s25, %s578_s17 }
  0x26   : > { %p582_p2 = pneg %p581_p0  ;;  %p588_p11 = por %p587_p12, %p586_p9 }
  0x28   : > { %p589_p4 = pnand %p588_p11, %p582_p2 }
  0x2a   : > { %592 = shalt.err (!%p589_p4)
}
  0x2b   : > { %s692_s26 = smov 32   ;;  %s693_s27 = smov 2  }
  0x2c   : > { %515 = dma.hbm_to_vmem [thread:$0]  (!%p787_p13), %s783_s28, 64, %s791_s30, %s118_s4, %s692_s26, %s692_s26, %s693_s27  }
  0x2d   : > { %p478_p3 = scmp.ge.s32.totalorder %s689_s12, 1  ;;  %p157_p5 = scmp.lt.s32.totalorder %s689_s12, 3 }
  0x2e   : > { %s475_s29 = sshll.u32 %s776_s23, 4  ;;  %s490_s6 = sshll.u32 %s689_s12, 8 }
  0x2f   : > { %p823_p9 = pnand %p478_p3, %p157_p5  ;;  %s142_s7 = scalar_lea.vmem [#allocation5], %s475_s29 }
  0x30   : > { %s149_s8 = sshll.u32 %s142_s7, 4  ;;  %s831_s17 = scalar_lea.hbm %s927_s1, %s490_s6  ;;  %s833_s8 = int_to_ptr.vmem [resolvable:$true] %s149_s8 }
  0x31   : > { %s139_s28 = scalar_lea.sflag [#allocation6], %s776_s23  ;;  %s593_s30 = scalar_lea.hbm %s831_s17, 256 }
  0x32   : > { %p594_p11 = scmp.ne.s32.totalorder %s831_s17, %s593_s30  ;;  %s598_s24 = scalar_lea.hbm %s927_s1, 512 }
  0x33   : > { %p599_p8 = scmp.lt.s32.totalorder %s831_s17, %s927_s1  ;;  %p600_p10 = scmp.lt.s32.totalorder %s598_s24, %s593_s30 }
  0x34   : > { %p596_p12 = pnand %p594_p11, %p567_p1 }
  0x35   : > { %p601_p0 = por %p600_p10, %p599_p8 }
  0x36   : > { %p597_p7 = pneg %p596_p12 }
  0x38   : > { %p602_p2 = pnand %p601_p0, %p597_p7 }
  0x3a   : > { %605 = shalt.err (!%p602_p2)
}
  0x3b   : > { %s606_s27 = scalar_lea.vmem %s833_s8, 256  ;;  %s694_s29 = smov [#allocation5]  }
  0x3c   : > { %p607_p4 = scmp.ne.s32.totalorder %s833_s8, %s606_s27  ;;  %s611_s6 = sshll.u32 %s694_s29, 4  ;;  %s612_s6 = int_to_ptr.vmem [resolvable:$false] %s611_s6 }
  0x3d   : > { %s613_s7 = scalar_lea.vmem %s612_s6, 512  ;;  %p614_p11 = scmp.lt.s32.totalorder %s833_s8, %s612_s6 }
  0x3e   : > { %p609_p3 = pnand %p607_p4, %p567_p1  ;;  %p615_p12 = scmp.lt.s32.totalorder %s613_s7, %s606_s27 }
  0x40   : > { %p610_p5 = pneg %p609_p3  ;;  %p616_p6 = por %p615_p12, %p614_p11 }
  0x42   : > { %p617_p8 = pnand %p616_p6, %p610_p5 }
  0x44   : > { %620 = shalt.err (!%p617_p8)
}
  0x45   : > { %s695_s14 = smov 128   ;;  %s696_s16 = smov 8  }
  0x46   : > { %518 = dma.hbm_to_vmem [thread:$0]  (!%p787_p13), %s831_s17, 256, %s833_s8, %s139_s28, %s695_s14, %s695_s14, %s696_s16  }
  0x47   : > { %161 = sbr.rel (%p823_p9) target bundleno = 292 (0x124), region = 28  ;;  %s863_s30 = sand.u32 (!%p823_p9), 1, %s681_s10  }
  0x48   : > { %s479_s4 = sshll.u32 (!%p823_p9), %s863_s30, 2  ;;  %s164_s19 = scalar_lea.sflag (!%p823_p9), [#allocation3], %s863_s30 }
  0x49   : > { %s167_s24 = scalar_lea.vmem (!%p823_p9), [#allocation2], %s479_s4  ;;  %p937_p6 = scmp.ne.s32.totalorder (!%p823_p9), %s932_s20, 0 }
  0x4c   : > { %664 = dma.done.wait (%p937_p6), %s164_s19, 64  }
  0x4d   : > { %666 = vsyncadd (%p937_p6), %s164_s19, 4294967232  ;;  %s480_s23 = sshll.u32 %s863_s30, 4  ;;  %s173_s3 = scalar_lea.sflag [#allocation6], %s863_s30 }
  0x4e   : > { %s176_s5 = scalar_lea.vmem [#allocation5], %s480_s23 }
  0x4f   : > { %668 = dma.done.wait (%p937_p6), %s173_s3, 256  }
  0x50   : > { %670 = vsyncadd (%p937_p6), %s173_s3, 4294967040  ;;  %v697_v0 = vmov 0.0   ;;  %vm698_vm0 = vmmov 0   ;;  %vm209_vm1 = vcmask 64512   ;;  %v207_v1 = vld [vmem:[%s176_s5] sm:$0xff]  ;;  %v208_v2 = vld [vmem:[%s176_s5 + $0x8] sm:$0xff] }
  0x51   : > { %496 = vmatprep.subr.mxu0 %v697_v0  ;;  %501 = vmatprep.subr.mxu1 %v697_v0  ;;  %v205_v3 = vld [vmem:[%s167_s24] sm:$0x3]  ;;  %v206_v4 = vld [vmem:[%s167_s24 + $0x2] sm:$0x3]  ;;  %s201_s20 = scalar_lea.vmem [#allocation7], %s479_s4  ;;  %s491_s17 = sshll.u32 %s738_s13, 6 }
  0x52   : > { %498 = vmatprep.mubr.msk.f32.mxu0 %vm698_vm0, %v697_v0  ;;  %503 = vmatprep.mubr.msk.f32.mxu1 %vm698_vm0, %v697_v0  ;;  %s373_s8 = sshll.u32 %s201_s20, 4  ;;  %vm356_vm2 = vcmask 58368   ;;  %s883_s26 = scalar_lea.hbm %s928_s2, %s491_s17  ;;  %s878_s8 = int_to_ptr.vmem [resolvable:$true] %s373_s8 }
  0x53   : > { %497 = vmatpush3.msra.mxu0 %v207_v1  ;;  %502 = vmatpush3.msra.mxu1 %v208_v2  ;;  %s360_s27 = scalar_lea.sflag [#allocation4], %s863_s30  ;;  %s621_s29 = scalar_lea.vmem %s878_s8, 64 }
  0x54   : > { %499 = vmatmul.mubr.msk.f32.vlgmr.msra.gmra.mxu0 %vm209_vm1, %v205_v3  ;;  %504 = vmatmul.mubr.msk.f32.vlgmr.msra.gmra.mxu1 %vm209_vm1, %v206_v4  ;;  %p622_p13 = scmp.ne.s32.totalorder %s878_s8, %s621_s29  ;;  %p938_p1 = scmp.ne.s32.totalorder %s933_s21, 0 }
  0x55   : > { %s699_s13 = smov [#allocation7]  }
  0x56   : > { %p623_p9 = pnand %p622_p13, %p938_p1  ;;  %s625_s6 = sshll.u32 %s699_s13, 4  ;;  %s626_s6 = int_to_ptr.vmem [resolvable:$false] %s625_s6 }
  0x57   : > { %s627_s7 = scalar_lea.vmem %s626_s6, 128  ;;  %p628_p10 = scmp.lt.s32.totalorder %s878_s8, %s626_s6 }
  0x58   : > { %p624_p7 = pneg %p623_p9  ;;  %p629_p0 = scmp.lt.s32.totalorder %s627_s7, %s621_s29 }
  0x5a   : > { %p630_p2 = por %p629_p0, %p628_p10 }
  0x5c   : > { %p631_p4 = pnand %p630_p2, %p624_p7 }
 0x114   : > { %v279_v5 = vpop.f32.mrf.mxu0  ;;  %v352_v6 = vpop.f32.mrf.mxu1 }
 0x115   : > { %357 = vst.msk [vmem:[%s201_s20] sm:$0x3] %vm356_vm2, %v279_v5  ;;  %358 = vst.msk [vmem:[%s201_s20 + $0x2] sm:$0x3] %vm356_vm2, %v352_v6 }
 0x116   : > { %v500_v7 = vpop.f32.mrf.mxu0  ;;  %v505_v8 = vpop.f32.mrf.mxu1 }
 0x117   : > { %634 = shalt.err (!%p631_p4)
}
 0x118   : > { %s635_s14 = scalar_lea.hbm %s883_s26, 64  ;;  %s639_s19 = scalar_lea.hbm %s928_s2, 128 }
 0x119   : > { %p636_p3 = scmp.ne.s32.totalorder %s883_s26, %s635_s14  ;;  %p640_p12 = scmp.lt.s32.totalorder %s883_s26, %s928_s2 }
 0x11a   : > { %p641_p8 = scmp.lt.s32.totalorder %s639_s19, %s635_s14 }
 0x11b   : > { %p637_p5 = pnand %p636_p3, %p938_p1 }
 0x11c   : > { %p642_p6 = por %p641_p8, %p640_p12 }
 0x11d   : > { %p638_p11 = pneg %p637_p5 }
 0x11f   : > { %p643_p13 = pnand %p642_p6, %p638_p11 }
 0x121   : > { %646 = shalt.err (!%p643_p13)
}
 0x122   : > { %s700_s3 = smov 32   ;;  %s701_s5 = smov 2  }
 0x123   : > { %510 = dma.vmem_to_hbm [thread:$0]  (%p938_p1), %s878_s8, 64, %s883_s26, %s360_s27, %s700_s3, %s700_s3, %s701_s5  }
 0x124 PF: > { %s388_s20 = sand.u32 1, %s677_s9   ;;  %p939_p9 = scmp.ne.s32.totalorder %s934_s22, 0 }
 0x125   : > { %p940_p7 = scmp.ge.s32.totalorder %s689_s12, 2  ;;  %s389_s17 = scalar_lea.sflag [#allocation4], %s388_s20 }
 0x127   : > { %p520_p10 = pnand %p940_p7, %p939_p9 }
 0x129   : > { %p521_p0 = pneg %p520_p10 }
 0x12b   : > { %672 = dma.done.wait (%p521_p0), %s389_s17, 64  }
 0x12c   : > { %674 = vsyncadd (%p521_p0), %s389_s17, 4294967232  ;;  %p18_p2 = scmp.ge.s32.totalorder %s742_s15, 4   ;;  %s941_s9 = smov %s681_s10 }
 0x12d   : > { %s942_s10 = smov %s685_s11  ;;  %s943_s11 = smov %s754_s18 }
 0x12e   : > { %s944_s12 = smov %s742_s15  ;;  %20 = sbr.rel (!%p18_p2) target bundleno = 7 (0x7), region = 86 }
 0x133   :  { %394 = vsyncpa [#allocation3], 1 }
 0x134   :  { %396 = vsyncpa [#allocation3 + $0x1], 1 }
 0x135   :  { %397 = vsyncpa [#allocation6], 1 }
 0x136   :  { %399 = vsyncpa [#allocation6 + $0x1], 1 }
 0x137   :  { %400 = vsyncpa [#allocation4], 1 }
 0x138   :  { %402 = vsyncpa [#allocation4 + $0x1], 1 }

</bundles_post_ra>
